<compile_context>
chip_gen: v7x
topology: tpu7x:2x2x1
jax: 0.10.0
libtpu: 0.0.40
codegen_flags: <defaults>
</compile_context>

<pallas_src>
import numpy as np
import jax
import jax.numpy as jnp
from jax.experimental import pallas as pl
from jax.experimental.pallas import tpu as pltpu

# args.preprocessing from the reference module; 'M' = mean-center, 'E' = L2-normalize
PREPROCESSING = "ME"

_LANE = 128
_SUBLANE = 8


def _round_up(x, m):
    return ((x + m - 1) // m) * m


def _choose_tile_n(N, D, C_pad, budget_bytes=24 << 20):
    """Row-tile sized to fit inside the default scoped-VMEM budget (conservative
    for v7x: 64 MiB physical / 32 MiB default scoped).  Streams the feature and
    output tiles (double-buffered) while the constant blocks stay resident."""
    def vmem_bytes(tn):
        # double-buffered feature + output tiles, double-buffered constant blocks
        return 4 * (2 * tn * (D + C_pad) + 2 * (D * C_pad + D + C_pad))

    tn = min(512, _round_up(max(N, 1), _SUBLANE))
    while tn > _SUBLANE and vmem_bytes(tn) > budget_bytes:
        tn //= 2
    return max(_SUBLANE, _round_up(tn, _SUBLANE))


def _ncm_kernel(feat_ref, mean_ref, ct_ref, csq_ref, out_ref):
    # feat_ref: [TN, D], mean_ref: [1, D], ct_ref: [D, Cp], csq_ref: [1, Cp]
    # out_ref:  [TN, Cp]
    x = feat_ref[...].astype(jnp.float32)
    mean = mean_ref[...].astype(jnp.float32)

    # --- preprocessing (same order/semantics as the PyTorch forward) ---
    for processing in PREPROCESSING:
        if processing == "M":
            x = x - mean
        elif processing == "E":
            # rsqrt lowers to the EUP slot instead of a VALU divide chain
            x = x * jax.lax.rsqrt(jnp.sum(x * x, axis=-1, keepdims=True))

    # --- pairwise Euclidean distance via the MXU ---
    # ||x - c||^2 = ||x||^2 + ||c||^2 - 2 * x @ c^T
    cross = jnp.dot(x, ct_ref[...].astype(jnp.float32),
                    preferred_element_type=jnp.float32)          # [TN, Cp]
    if PREPROCESSING.endswith("E"):
        # rows are exactly unit-norm after the final 'E' step; skip the reduce
        x_sq = jnp.float32(1.0)
    else:
        x_sq = jnp.sum(x * x, axis=-1, keepdims=True)            # [TN, 1]

    d2 = (x_sq - 2.0 * cross) + csq_ref[...]
    d2 = jnp.maximum(d2, 0.0)      # clamp fp cancellation before sqrt (NaN guard)
    out_ref[...] = -jnp.sqrt(d2)   # sqrt also rides the EUP slot


def ncm_forward(features, mean, centroids, *, tile_n=None):
    """Pallas-backed NCM forward.  features:[N,D], mean:[D], centroids:[C,D]."""
    N, D = features.shape
    C = centroids.shape[0]

    # Lane-dense class axis: unmasked output stores + full MXU feed.  Zero-padded
    # phantom centroids are simply sliced away at the end.
    C_pad = _round_up(max(C, 1), _LANE)
    if tile_n is None:
        tile_n = _choose_tile_n(N, D, C_pad)
    tile_n = max(_SUBLANE, _round_up(tile_n, _SUBLANE))
    N_pad = _round_up(max(N, 1), tile_n)
    grid_n = N_pad // tile_n

    feats = features.astype(jnp.float32)
    if N_pad != N:
        feats = jnp.pad(feats, ((0, N_pad - N), (0, 0)))

    mean2d = mean.reshape(1, D).astype(jnp.float32)

    cents = centroids.astype(jnp.float32)
    cent_t = jnp.pad(cents.T, ((0, 0), (0, C_pad - C)))                  # [D, Cp]
    cent_sq = jnp.pad(jnp.sum(cents * cents, axis=1),
                      (0, C_pad - C)).reshape(1, C_pad)                  # [1, Cp]

    cost = pl.CostEstimate(
        flops=2 * N_pad * C_pad * D,
        transcendentals=N_pad + N_pad * C_pad,
        bytes_accessed=4 * (N_pad * D + D * C_pad + D + C_pad + N_pad * C_pad),
    )

    out = pl.pallas_call(
        _ncm_kernel,
        out_shape=jax.ShapeDtypeStruct((N_pad, C_pad), jnp.float32),
        grid_spec=pltpu.PrefetchScalarGridSpec(
            num_scalar_prefetch=0,
            grid=(grid_n,),
            in_specs=[
                pl.BlockSpec((tile_n, D), lambda i: (i, 0)),     # features tile
                pl.BlockSpec((1, D), lambda i: (0, 0)),          # mean (resident)
                pl.BlockSpec((D, C_pad), lambda i: (0, 0)),      # centroids^T (resident)
                pl.BlockSpec((1, C_pad), lambda i: (0, 0)),      # ||c||^2 (resident)
            ],
            out_specs=pl.BlockSpec((tile_n, C_pad), lambda i: (i, 0)),
        ),
        compiler_params=pltpu.CompilerParams(
            dimension_semantics=("parallel",)),
        cost_estimate=cost,
    )(feats, mean2d, cent_t, cent_sq)

    return out[:N, :C]


# ----------------------- plain-JAX glue (cache_shots) -----------------------
def cache_shots(shots, labels, num_classes, preprocessing=PREPROCESSING):
    """Reproduces NCM.cache_shots: returns (mean, centroids)."""
    mean = shots.mean(axis=0)                          # [D]
    s = shots
    for processing in preprocessing:
        if processing == "M":
            s = s - mean
        elif processing == "E":
            s = s / jnp.linalg.norm(s, axis=1, keepdims=True)
    cents = []
    for label in range(num_classes):
        m = (labels == label).astype(s.dtype)[:, None]
        cents.append(jnp.sum(s * m, axis=0) / jnp.sum(m))
    centroids = jnp.stack(cents, axis=0)               # [C, D]
    return mean, centroids


# ----------------------------- reference (JAX) ------------------------------
def ncm_forward_ref(features, mean, centroids, preprocessing=PREPROCESSING):
    x = features
    for processing in preprocessing:
        if processing == "M":
            x = x - mean
        elif processing == "E":
            x = x / jnp.linalg.norm(x, axis=1, keepdims=True)
    d = jnp.linalg.norm(x[:, None, :] - centroids[None, :, :], axis=2)
    return -d


if __name__ == "__main__":
    key = jax.random.PRNGKey(0)

    # --- test 1: small shapes matching the module's typical use ---
    D, C, N_SHOTS, N_QUERY = 32, 4, 16, 8
    k1, k2 = jax.random.split(key)
    shots = jax.random.normal(k1, (N_SHOTS, D), dtype=jnp.float32)
    labels = jnp.arange(N_SHOTS, dtype=jnp.int32) % C
    features = jax.random.normal(k2, (N_QUERY, D), dtype=jnp.float32)

    mean, centroids = cache_shots(shots, labels, C)
    out = jax.block_until_ready(ncm_forward(features, mean, centroids))
    ref = ncm_forward_ref(features, mean, centroids)
    assert out.shape == (N_QUERY, C)
    assert np.allclose(np.asarray(out), np.asarray(ref), atol=1e-4, rtol=1e-4)

    # --- test 2: exercises N padding, multi-step grid and C padding to 128 ---
    D2, C2, N_SHOTS2, N_QUERY2 = 64, 10, 40, 40
    k3, k4 = jax.random.split(k2)
    shots2 = jax.random.normal(k3, (N_SHOTS2, D2), dtype=jnp.float32)
    labels2 = jnp.arange(N_SHOTS2, dtype=jnp.int32) % C2
    features2 = jax.random.normal(k4, (N_QUERY2, D2), dtype=jnp.float32)

    mean2, centroids2 = cache_shots(shots2, labels2, C2)
    out2 = jax.block_until_ready(ncm_forward(features2, mean2, centroids2, tile_n=16))
    ref2 = ncm_forward_ref(features2, mean2, centroids2)
    assert out2.shape == (N_QUERY2, C2)
    assert np.allclose(np.asarray(out2), np.asarray(ref2), atol=1e-4, rtol=1e-4)

    print("KERNEL_OK")
</pallas_src>

<mosaic_0001>
module attributes {stable_mosaic.version = 11 : i64} {
  func.func @_ncm_kernel(%arg0: i32, %arg1: memref<8x32xf32, #tpu.memory_space<vmem>>, %arg2: memref<1x32xf32, #tpu.memory_space<vmem>>, %arg3: memref<32x128xf32, #tpu.memory_space<vmem>>, %arg4: memref<1x128xf32, #tpu.memory_space<vmem>>, %arg5: memref<8x128xf32, #tpu.memory_space<vmem>>) attributes {dimension_semantics = [#tpu.dimension_semantics<parallel>], iteration_bounds = array<i64: 1>, scalar_prefetch = 0 : i64, scratch_operands = 0 : i64, tpu.core_type = #tpu.core_type<tc>, window_params = [{transform_indices = @transform_0, window_bounds = array<i64: 8, 32>}, {pipeline_mode = #tpu.pipeline_mode<synchronous>, transform_indices = @transform_1, window_bounds = array<i64: 1, 32>}, {pipeline_mode = #tpu.pipeline_mode<synchronous>, transform_indices = @transform_2, window_bounds = array<i64: 32, 128>}, {pipeline_mode = #tpu.pipeline_mode<synchronous>, transform_indices = @transform_3, window_bounds = array<i64: 1, 128>}, {transform_indices = @transform_4, window_bounds = array<i64: 8, 128>}]} {
    %c0 = arith.constant 0 : index
    %c0_0 = arith.constant 0 : index
    %0 = vector.load %arg1[%c0, %c0_0] : memref<8x32xf32, #tpu.memory_space<vmem>>, vector<8x32xf32>
    %c0_1 = arith.constant 0 : index
    %c0_2 = arith.constant 0 : index
    %1 = vector.load %arg2[%c0_1, %c0_2] : memref<1x32xf32, #tpu.memory_space<vmem>>, vector<1x32xf32>
    %2 = vector.broadcast %1 : vector<1x32xf32> to vector<8x32xf32>
    %3 = arith.subf %0, %2 : vector<8x32xf32>
    %4 = arith.mulf %3, %3 : vector<8x32xf32>
    %cst = arith.constant dense<0.000000e+00> : vector<8xf32>
    %5 = vector.multi_reduction <add>, %4, %cst [1] : vector<8x32xf32> to vector<8xf32>
    %6 = vector.shape_cast %5 : vector<8xf32> to vector<8x1xf32>
    %7 = math.rsqrt %6 : vector<8x1xf32>
    %8 = vector.broadcast %7 : vector<8x1xf32> to vector<8x32xf32>
    %9 = arith.mulf %3, %8 : vector<8x32xf32>
    %c0_3 = arith.constant 0 : index
    %c0_4 = arith.constant 0 : index
    %10 = vector.load %arg3[%c0_3, %c0_4] : memref<32x128xf32, #tpu.memory_space<vmem>>, vector<32x128xf32>
    %cst_5 = arith.constant dense<0.000000e+00> : vector<8x128xf32>
    %11 = tpu.matmul %9, %10, %cst_5 {dimension_numbers = #tpu.dot_dimension_numbers<[1], [0], [0], [1], [0, 0, 1, 1], [], []>} : vector<8x32xf32>, vector<32x128xf32>, vector<8x128xf32> -> vector<8x128xf32>
    %cst_6 = arith.constant 2.000000e+00 : f32
    %12 = vector.broadcast %cst_6 : f32 to vector<8x128xf32>
    %13 = arith.mulf %12, %11 : vector<8x128xf32>
    %cst_7 = arith.constant 1.000000e+00 : f32
    %14 = vector.broadcast %cst_7 : f32 to vector<8x128xf32>
    %15 = arith.subf %14, %13 : vector<8x128xf32>
    %c0_8 = arith.constant 0 : index
    %c0_9 = arith.constant 0 : index
    %16 = vector.load %arg4[%c0_8, %c0_9] : memref<1x128xf32, #tpu.memory_space<vmem>>, vector<1x128xf32>
    %17 = vector.broadcast %16 : vector<1x128xf32> to vector<8x128xf32>
    %18 = arith.addf %15, %17 : vector<8x128xf32>
    %cst_10 = arith.constant 0.000000e+00 : f32
    %19 = vector.broadcast %cst_10 : f32 to vector<8x128xf32>
    %20 = arith.maximumf %18, %19 : vector<8x128xf32>
    %21 = math.sqrt %20 : vector<8x128xf32>
    %cst_11 = arith.constant 0.000000e+00 : f32
    %22 = vector.broadcast %cst_11 : f32 to vector<8x128xf32>
    %23 = arith.subf %22, %21 : vector<8x128xf32>
    %c0_12 = arith.constant 0 : index
    %c0_13 = arith.constant 0 : index
    %24 = vector.load %arg5[%c0_12, %c0_13] : memref<8x128xf32, #tpu.memory_space<vmem>>, vector<8x128xf32>
    tpu.vector_store %arg5[%c0_12, %c0_13], %23 {strides = array<i32>} : memref<8x128xf32, #tpu.memory_space<vmem>>, vector<8x128xf32>,
    return
  }
  func.func @transform_0(%arg0: i32) -> (i32, i32) {
    %c0_i32 = arith.constant 0 : i32
    %c0_i32_0 = arith.constant 0 : i32
    return %arg0, %c0_i32 : i32, i32
  }
  func.func @transform_1(%arg0: i32) -> (i32, i32) {
    %c0_i32 = arith.constant 0 : i32
    %c0_i32_0 = arith.constant 0 : i32
    %c0_i32_1 = arith.constant 0 : i32
    return %c0_i32, %c0_i32_0 : i32, i32
  }
  func.func @transform_2(%arg0: i32) -> (i32, i32) {
    %c0_i32 = arith.constant 0 : i32
    %c0_i32_0 = arith.constant 0 : i32
    %c0_i32_1 = arith.constant 0 : i32
    return %c0_i32, %c0_i32_0 : i32, i32
  }
  func.func @transform_3(%arg0: i32) -> (i32, i32) {
    %c0_i32 = arith.constant 0 : i32
    %c0_i32_0 = arith.constant 0 : i32
    %c0_i32_1 = arith.constant 0 : i32
    return %c0_i32, %c0_i32_0 : i32, i32
  }
  func.func @transform_4(%arg0: i32) -> (i32, i32) {
    %c0_i32 = arith.constant 0 : i32
    %c0_i32_0 = arith.constant 0 : i32
    return %arg0, %c0_i32 : i32, i32
  }
}

</mosaic_0001>

<bundles_post_ra>
// kernel: tpu_custom_call.1
= control target key start
LH: loop header
LB: loop body
LE: loop exit
PB: predicated region body
PF: predicated region fallthrough
CT: control target
= control target key end

     0   :  { %9 = vsyncpa [#allocation3], 0  ;;  %s366_s0 = inlined_call_operand.hbm [shape: f32[8,32], index: 0, kind: input, shape index: {}]   ;;  %s367_s1 = inlined_call_operand.vmem [shape: f32[1,32], index: 1, kind: input, shape index: {}]   ;;  %s368_s2 = inlined_call_operand.hbm [shape: f32[32,128], index: 2, kind: input, shape index: {}]   ;;  %s369_s3 = inlined_call_operand.vmem [shape: f32[1,128], index: 3, kind: input, shape index: {}]   ;;  %s370_s4 = inlined_call_operand.hbm [shape: f32[8,128], index: 4, kind: output, shape index: {}]  }
   0x1   :  { %10 = vsyncpa [#allocation6], 0 }
   0x2   :  { %11 = vsyncpa [#allocation4], 0  ;;  %s282_s15 = smov [#allocation2]   ;;  %s283_s17 = smov [#allocation5]  }
   0x3   :  { %s18_s16 = sshll.u32 %s282_s15, 4  ;;  %s29_s18 = sshll.u32 %s283_s17, 4  ;;  %s19_s16 = int_to_ptr.vmem [resolvable:$true] %s18_s16  ;;  %s315_s18 = int_to_ptr.vmem [resolvable:$true] %s29_s18 }
   0x4   :  { %s210_s21 = scalar_lea.hbm %s366_s0, 128 }
   0x5   :  { %p211_p0 = scmp.ne.s32.totalorder %s366_s0, %s210_s21  ;;  %p214_p1 = scmp.lt.u32.totalorder %s210_s21, %s366_s0 }
   0x7   :  { %p216_p2 = pnand %p214_p1, %p211_p0 }
   0x9   :  { %219 = shalt.err (!%p216_p2)
}
   0xa   :  { %s220_s26 = scalar_lea.vmem %s19_s16, 128  ;;  %p225_p4 = scmp.lt.s32.totalorder %s19_s16, %s19_s16 }
   0xb   :  { %p221_p3 = scmp.ne.s32.totalorder %s19_s16, %s220_s26  ;;  %p226_p5 = scmp.lt.s32.totalorder %s220_s26, %s220_s26 }
   0xd   :  { %p227_p6 = por %p226_p5, %p225_p4 }
   0xf   :  { %p228_p7 = pnand %p227_p6, %p221_p3 }
  0x11   :  { %231 = shalt.err (!%p228_p7)
}
  0x12   :  { %21 = dma.hbm_to_vmem [thread:$0]  %s366_s0, 128, %s19_s16, [#allocation3]  }
  0x13   :  { %s232_s5 = scalar_lea.hbm %s368_s2, 512 }
  0x14   :  { %p233_p8 = scmp.ne.s32.totalorder %s368_s2, %s232_s5  ;;  %p236_p9 = scmp.lt.u32.totalorder %s232_s5, %s368_s2 }
  0x16   :  { %p238_p10 = pnand %p236_p9, %p233_p8 }
  0x18   :  { %241 = shalt.err (!%p238_p10)
}
  0x19   :  { %s242_s10 = scalar_lea.vmem %s315_s18, 512  ;;  %p247_p12 = scmp.lt.s32.totalorder %s315_s18, %s315_s18 }
  0x1a   :  { %p243_p11 = scmp.ne.s32.totalorder %s315_s18, %s242_s10  ;;  %p248_p13 = scmp.lt.s32.totalorder %s242_s10, %s242_s10 }
  0x1c   :  { %p249_p0 = por %p248_p13, %p247_p12 }
  0x1e   :  { %p250_p1 = pnand %p249_p0, %p243_p11 }
  0x20   :  { %253 = shalt.err (!%p250_p1)
}
  0x21   :  { %s284_s0 = smov 128   ;;  %s285_s11 = smov 8  }
  0x22   :  { %35 = dma.hbm_to_vmem [thread:$0]  %s368_s2, 512, %s315_s18, [#allocation6], %s284_s0, %s284_s0, %s285_s11  }
  0x23   :  { %276 = dma.done.wait [#allocation3], 128  }
  0x24   :  { %277 = vsyncadd [#allocation3], 4294967168 }
  0x25   :  { %278 = dma.done.wait [#allocation6], 512  }
  0x26   :  { %279 = vsyncadd [#allocation6], 4294966784  ;;  %v44_v0 = vld [vmem:[#allocation2] sm:$0xff]  ;;  %vm54_vm0 = vcmask 261120   ;;  %v60_v5 = vld [vmem:[#allocation5] sm:$0xff]  ;;  %v286_v8 = vmov 0.0|0.0  }
  0x27   :  { %v173_v1 = vld [vmem:[%s367_s1] ss:$0 sm:$0xff]  ;;  %v61_v6 = vld [vmem:[#allocation5 + $0x8] sm:$0xff]  ;;  %v62_v7 = vld [vmem:[#allocation5 + $0x10] sm:$0xff]  ;;  %192 = vmatprep.subr.bf16.mxu0 %v286_v8  ;;  %vm287_vm1 = vmmov 0   ;;  %v288_v11 = vmov 0.0  }
  0x28   :  { %v52_v2 = vsub.f32 %v44_v0, %v173_v1  ;;  %v193_v9 = vpack.c.bf16 %v61_v6, %v60_v5  ;;  %v63_v10 = vld [vmem:[#allocation5 + $0x18] sm:$0xff]  ;;  %189 = vmatprep.mubr.msk.f32.mxu0 %vm287_vm1, %v288_v11  ;;  %s289_s16 = smov [#allocation7]  }
  0x29   :  { %v196_v12 = vpack.c.bf16 %v63_v10, %v62_v7  ;;  %v175_v19 = vld [vmem:[%s369_s3] ss:$0 sm:$0xff]  ;;  %s163_s17 = sshll.u32 %s289_s16, 4  ;;  %s164_s17 = int_to_ptr.vmem [resolvable:$true] %s163_s17 }
  0x2a   :  { %v53_v3 = vmul.f32 %v52_v2, %v52_v2  ;;  %194 = vmatpush3.bf16.msra.mxu0 %v193_v9  ;;  %s254_s18 = scalar_lea.vmem %s164_s17, 128  ;;  %p259_p3 = scmp.lt.s32.totalorder %s164_s17, %s164_s17 }
  0x2b   :  { %195 = vmatprep.subr.bf16.mxu0 %v286_v8  ;;  %p255_p2 = scmp.ne.s32.totalorder %s164_s17, %s254_s18  ;;  %p260_p4 = scmp.lt.s32.totalorder %s254_s18, %s254_s18 }
  0x2c   :  { %v55_v4 = vsel %vm54_vm0, %v53_v3, 0.0 }
  0x2d   :  { %56 = vadd.xlane.f32.xlu0 %v55_v4  ;;  %p261_p5 = por %p260_p4, %p259_p3 }
  0x2e   :  { %197 = vmatpush3.bf16.msra.mxu0 %v196_v12 }
  0x2f   :  { %p262_p6 = pnand %p261_p5, %p255_p2 }
  0xba   :  { %v57_v13 = vpop.xlane.xlu0 %56 }
  0xbb   :  { %206 = vrsqrt.f32 %v57_v13 }
  0xc5   :  { %v207_v14 = vpop.eup %206 }
  0xc6   :  { %v59_v15 = vmul.f32 %v207_v14, %v52_v2 }
  0xc8   :  { %190 = vmatmul.mubr.msk.f32.vlgmr.msra.gmra.mrb[0].mxu0 %vm54_vm0, %v59_v15 }
 0x19b   :  { %v133_v16 = vpop.f32.mrb[0].mxu0 }
 0x19c   :  { %v137_v17 = vmul.f32 2.0, %v133_v16  ;;  %v191_v18 = vpop.f32.mrb[1].mxu0 }
 0x19e   :  { %v138_v20 = vsub.f32 1.0, %v137_v17 }
 0x1a0   :  { %v146_v21 = vadd.f32 %v175_v19, %v138_v20 }
 0x1a2   :  { %v147_v22 = vmax.f32 %v146_v21, 0.0 }
 0x1a4   :  { %208 = vrsqrt.f32 %v147_v22  ;;  %vm150_vm2 = vcmp.eq.f32.partialorder %v147_v22, inf  ;;  %v153_v25 = vand.u32 2147483648, %v147_v22  ;;  %vm152_vm3 = vcmp.eq.f32.partialorder %v147_v22, 0.0 }
 0x1ae   :  { %v209_v23 = vpop.eup %208 }
 0x1af   :  { %v149_v24 = vmul.f32 %v209_v23, %v147_v22 }
 0x1b1   :  { %v151_v26 = vsel %vm150_vm2, %v147_v22, %v149_v24 }
 0x1b2   :  { %v154_v27 = vsel %vm152_vm3, %v153_v25, %v151_v26 }
 0x1b3   :  { %v155_v28 = vsub.f32 0.0, %v154_v27 }
 0x1b5   :  { %156 = vst [vmem:[#allocation7] sm:$0xff] %v155_v28 }
 0x1b6   :  { %265 = shalt.err (!%p262_p6)
}
 0x1b7   :  { %s266_s20 = scalar_lea.hbm %s370_s4, 128 }
 0x1b8   :  { %p267_p7 = scmp.ne.s32.totalorder %s370_s4, %s266_s20  ;;  %p270_p8 = scmp.lt.u32.totalorder %s266_s20, %s370_s4 }
 0x1ba   :  { %p272_p9 = pnand %p270_p8, %p267_p7 }
 0x1bc   :  { %275 = shalt.err (!%p272_p9)
}
 0x1bd   :  { %166 = dma.vmem_to_hbm [thread:$0]  %s164_s17, 128, %s370_s4, [#allocation4]  }
 0x1be   :  { %280 = dma.done.wait [#allocation4], 128  }
 0x1bf   :  { %281 = vsyncadd [#allocation4], 4294967168 }
 0x1c0   :  { %170 = vsyncpa [#allocation3], 1 }
 0x1c1   :  { %171 = vsyncpa [#allocation6], 1 }
 0x1c2   :  { %172 = vsyncpa [#allocation4], 1 }

</bundles_post_ra>
